<compile_context>
chip_gen: v6e
topology: v6e:2x2x1
jax: 0.10.0
libtpu: 0.0.40
codegen_flags: <defaults>
</compile_context>

<pallas_src>
import functools
import math

import jax
import jax.numpy as jnp
from jax import lax
from jax.experimental import pallas as pl
from jax.experimental.pallas import tpu as pltpu


def _gah_kernel(q_ref, k_ref, v_ref,
                wq_ref, bq_ref, wk_ref, bk_ref, wv_ref, bv_ref,
                m_ref, o_ref, *,
                scale, is_causal, apply_key_mask, n_heads, d_q, d_v, mm_dtype):
    bt, Lq, d_model = q_ref.shape
    Lk = k_ref.shape[1]
    f32 = jnp.float32

    # ---- Projections: hoisted out of the head loop, Q heads fused -----------
    q_in = q_ref[...].reshape(bt * Lq, d_model).astype(mm_dtype)
    k_in = k_ref[...].reshape(bt * Lk, d_model).astype(mm_dtype)
    v_in = v_ref[...].reshape(bt * Lk, d_model).astype(mm_dtype)

    q_all = jnp.dot(q_in, wq_ref[...].astype(mm_dtype),
                    preferred_element_type=f32) + bq_ref[...]      # (bt*Lq, H*d_q)
    q_all = q_all * scale        # fold 1/sqrt(d_q) into q, not the score tile
    k_all = jnp.dot(k_in, wk_ref[...].astype(mm_dtype),
                    preferred_element_type=f32) + bk_ref[...]      # (bt*Lk, d_k)
    v_all = jnp.dot(v_in, wv_ref[...].astype(mm_dtype),
                    preferred_element_type=f32) + bv_ref[...]      # (bt*Lk, d_v)

    if is_causal:
        row = lax.broadcasted_iota(jnp.int32, (Lq, Lk), 0)
        col = lax.broadcasted_iota(jnp.int32, (Lq, Lk), 1)
        causal_keep = col <= row

    outs = []
    for b in range(bt):                                   # static unroll (bt small)
        kb = k_all[b * Lk:(b + 1) * Lk, :].astype(mm_dtype)
        vb = v_all[b * Lk:(b + 1) * Lk, :].astype(mm_dtype)

        keep = None
        if apply_key_mask:
            keep = (m_ref[b] != 0)                        # (1, Lk), bcast over Lq
        if is_causal:
            keep = causal_keep if keep is None else (keep & causal_keep)

        head_outs = []
        for h in range(n_heads):                          # static unroll (H small)
            qh = q_all[b * Lq:(b + 1) * Lq,
                       h * d_q:(h + 1) * d_q].astype(mm_dtype)     # (Lq, d_q)
            # QK^T: contract last dims directly — no explicit transpose.
            s = lax.dot_general(qh, kb, (((1,), (1,)), ((), ())),
                                preferred_element_type=f32)        # (Lq, Lk)
            if keep is not None:
                # NOTE: a fully-masked row yields NaN, matching torch SDPA.
                s = jnp.where(keep, s, -jnp.inf)
            m = jnp.max(s, axis=-1, keepdims=True)
            p = jnp.exp(s - m)
            denom = jnp.sum(p, axis=-1, keepdims=True)
            o_h = jnp.dot(p.astype(mm_dtype), vb,
                          preferred_element_type=f32)              # (Lq, d_v)
            o_h = o_h * pl.reciprocal(denom, approx=True)          # EUP, not a divide
            head_outs.append(o_h)
        outs.append(jnp.concatenate(head_outs, axis=-1))           # (Lq, H*d_v)

    # One lane-dense store covering all heads of all packed batch rows.
    o_ref[...] = jnp.stack(outs, axis=0).astype(o_ref.dtype)       # (bt, Lq, H*d_v)


def group_attention_head(query, key, value, wq, bq, wk, bk, wv, bv,
                         attn_mask=None, is_causal=False,
                         batch_block=None, use_bf16_matmul=False):
    """query/key/value: (B, L, d_model). wq: (H, d_model, d_q), bq: (H, d_q),
    wk: (d_model, d_k), bk: (d_k,), wv: (d_model, d_v), bv: (d_v,).
    attn_mask (optional): (B, Lk) bool key-padding mask, True = attend.
    Returns (B, H, Lq, d_v), matching the PyTorch module."""
    B, Lq, d_model = query.shape
    Lk = key.shape[1]
    H, _, d_q = wq.shape
    d_k = wk.shape[1]
    d_v = wv.shape[1]
    assert d_q == d_k, "q/k feature dims must match for QK^T"

    # Pack several batch rows per grid step when sequences are short.
    if batch_block is None:
        cap = max(1, min(8, 256 // max(Lq, Lk, 1)))
        batch_block = 1
        for cand in range(min(cap, B), 0, -1):
            if B % cand == 0:
                batch_block = cand
                break
    bt = batch_block
    assert B % bt == 0
    nb = B // bt

    apply_key_mask = attn_mask is not None
    if attn_mask is None:
        mask = jnp.ones((B, 1, Lk), jnp.int32)
    else:
        mask = attn_mask.astype(jnp.int32).reshape(B, 1, Lk)

    # Pack per-head Q weights into one (d_model, H*d_q) operand.
    wq_packed = jnp.transpose(wq, (1, 0, 2)).reshape(d_model, H * d_q)
    bq_packed = bq.reshape(1, H * d_q)
    bk2 = bk.reshape(1, d_k)
    bv2 = bv.reshape(1, d_v)
    scale = 1.0 / math.sqrt(d_q)
    mm_dtype = jnp.bfloat16 if use_bf16_matmul else jnp.float32

    kernel = functools.partial(
        _gah_kernel, scale=scale, is_causal=is_causal,
        apply_key_mask=apply_key_mask, n_heads=H, d_q=d_q, d_v=d_v,
        mm_dtype=mm_dtype)

    flops = (2 * B * (Lq * d_model * H * d_q + Lk * d_model * (d_k + d_v))
             + 2 * B * H * Lq * Lk * (d_q + d_v))
    transcendentals = B * H * Lq * Lk
    bytes_accessed = 4 * (B * (Lq + 2 * Lk) * d_model
                          + d_model * (H * d_q + d_k + d_v)
                          + H * d_q + d_k + d_v
                          + B * Lk + B * Lq * H * d_v)

    out = pl.pallas_call(
        kernel,
        out_shape=jax.ShapeDtypeStruct((B, Lq, H * d_v), query.dtype),
        grid_spec=pltpu.PrefetchScalarGridSpec(
            num_scalar_prefetch=0,
            grid=(nb,),
            in_specs=[
                pl.BlockSpec((bt, Lq, d_model), lambda i: (i, 0, 0)),   # query
                pl.BlockSpec((bt, Lk, d_model), lambda i: (i, 0, 0)),   # key
                pl.BlockSpec((bt, Lk, d_model), lambda i: (i, 0, 0)),   # value
                pl.BlockSpec((d_model, H * d_q), lambda i: (0, 0)),     # Wq (packed)
                pl.BlockSpec((1, H * d_q), lambda i: (0, 0)),           # bq (packed)
                pl.BlockSpec((d_model, d_k), lambda i: (0, 0)),         # Wk (shared)
                pl.BlockSpec((1, d_k), lambda i: (0, 0)),               # bk
                pl.BlockSpec((d_model, d_v), lambda i: (0, 0)),         # Wv (shared)
                pl.BlockSpec((1, d_v), lambda i: (0, 0)),               # bv
                pl.BlockSpec((bt, 1, Lk), lambda i: (i, 0, 0)),         # key mask
            ],
            out_specs=pl.BlockSpec((bt, Lq, H * d_v), lambda i: (i, 0, 0)),
        ),
        compiler_params=pltpu.CompilerParams(
            dimension_semantics=("parallel",)),
        cost_estimate=pl.CostEstimate(
            flops=flops, transcendentals=transcendentals,
            bytes_accessed=int(bytes_accessed)),
    )(query, key, value, wq_packed, bq_packed, wk, bk2, wv, bv2, mask)

    # (B, Lq, H*d_v) -> (B, H, Lq, d_v), matching the PyTorch module output.
    return jnp.transpose(out.reshape(B, Lq, H, d_v), (0, 2, 1, 3))


def _reference(query, key, value, wq, bq, wk, bk, wv, bv,
               attn_mask=None, is_causal=False):
    d_q = wq.shape[-1]
    qp = jnp.einsum('bld,hdf->bhlf', query, wq) + bq[None, :, None, :]
    kp = key @ wk + bk
    vp = value @ wv + bv
    s = jnp.einsum('bhqf,bkf->bhqk', qp, kp) / math.sqrt(d_q)
    Lq, Lk = s.shape[-2], s.shape[-1]
    keep = jnp.ones((1, 1, Lq, Lk), bool)
    if attn_mask is not None:
        keep = keep & attn_mask[:, None, None, :]
    if is_causal:
        keep = keep & jnp.tril(jnp.ones((Lq, Lk), bool))[None, None]
    s = jnp.where(keep, s, -jnp.inf)
    p = jax.nn.softmax(s, axis=-1)
    return jnp.einsum('bhqk,bkf->bhqf', p, vp)


if __name__ == "__main__":
    # Small shapes consistent with the module's forward.
    B, L, d_model = 2, 8, 32
    d_q = d_k = 16
    d_v = 16
    n_heads = 2

    key0 = jax.random.PRNGKey(0)
    ks = jax.random.split(key0, 9)
    query = jax.random.normal(ks[0], (B, L, d_model), jnp.float32)
    kkey = jax.random.normal(ks[1], (B, L, d_model), jnp.float32)
    value = jax.random.normal(ks[2], (B, L, d_model), jnp.float32)

    wq = jax.random.normal(ks[3], (n_heads, d_model, d_q), jnp.float32) * 0.1
    bq = jax.random.normal(ks[4], (n_heads, d_q), jnp.float32) * 0.1
    wk = jax.random.normal(ks[5], (d_model, d_k), jnp.float32) * 0.1
    bk = jax.random.normal(ks[6], (d_k,), jnp.float32) * 0.1
    wv = jax.random.normal(ks[7], (d_model, d_v), jnp.float32) * 0.1
    bv = jax.random.normal(ks[8], (d_v,), jnp.float32) * 0.1

    # 1) plain (no mask, no causal)
    out = group_attention_head(query, kkey, value, wq, bq, wk, bk, wv, bv)
    out = jax.block_until_ready(out)
    assert out.shape == (B, n_heads, L, d_v)
    ref = _reference(query, kkey, value, wq, bq, wk, bk, wv, bv)
    assert jnp.allclose(out, ref, atol=2e-3, rtol=2e-3), (
        float(jnp.max(jnp.abs(out - ref))))

    # 2) key-padding mask + causal
    lens = jnp.array([8, 5], jnp.int32)
    pad_mask = (jnp.arange(L)[None, :] < lens[:, None])            # (B, Lk) bool
    out2 = group_attention_head(query, kkey, value, wq, bq, wk, bk, wv, bv,
                                attn_mask=pad_mask, is_causal=True)
    out2 = jax.block_until_ready(out2)
    ref2 = _reference(query, kkey, value, wq, bq, wk, bk, wv, bv,
                      attn_mask=pad_mask, is_causal=True)
    assert jnp.allclose(out2, ref2, atol=2e-3, rtol=2e-3), (
        float(jnp.max(jnp.abs(out2 - ref2))))

    print("KERNEL_OK")
</pallas_src>

<mosaic_0001>
module attributes {stable_mosaic.version = 11 : i64} {
  func.func @_gah_kernel(%arg0: i32, %arg1: memref<2x8x32xf32, #tpu.memory_space<vmem>>, %arg2: memref<2x8x32xf32, #tpu.memory_space<vmem>>, %arg3: memref<2x8x32xf32, #tpu.memory_space<vmem>>, %arg4: memref<32x32xf32, #tpu.memory_space<vmem>>, %arg5: memref<1x32xf32, #tpu.memory_space<vmem>>, %arg6: memref<32x16xf32, #tpu.memory_space<vmem>>, %arg7: memref<1x16xf32, #tpu.memory_space<vmem>>, %arg8: memref<32x16xf32, #tpu.memory_space<vmem>>, %arg9: memref<1x16xf32, #tpu.memory_space<vmem>>, %arg10: memref<2x1x8xi32, #tpu.memory_space<vmem>>, %arg11: memref<2x8x32xf32, #tpu.memory_space<vmem>>) attributes {dimension_semantics = [#tpu.dimension_semantics<parallel>], iteration_bounds = array<i64: 1>, scalar_prefetch = 0 : i64, scratch_operands = 0 : i64, tpu.core_type = #tpu.core_type<tc>, window_params = [{transform_indices = @transform_0, window_bounds = array<i64: 2, 8, 32>}, {transform_indices = @transform_1, window_bounds = array<i64: 2, 8, 32>}, {transform_indices = @transform_2, window_bounds = array<i64: 2, 8, 32>}, {pipeline_mode = #tpu.pipeline_mode<synchronous>, transform_indices = @transform_3, window_bounds = array<i64: 32, 32>}, {pipeline_mode = #tpu.pipeline_mode<synchronous>, transform_indices = @transform_4, window_bounds = array<i64: 1, 32>}, {pipeline_mode = #tpu.pipeline_mode<synchronous>, transform_indices = @transform_5, window_bounds = array<i64: 32, 16>}, {pipeline_mode = #tpu.pipeline_mode<synchronous>, transform_indices = @transform_6, window_bounds = array<i64: 1, 16>}, {pipeline_mode = #tpu.pipeline_mode<synchronous>, transform_indices = @transform_7, window_bounds = array<i64: 32, 16>}, {pipeline_mode = #tpu.pipeline_mode<synchronous>, transform_indices = @transform_8, window_bounds = array<i64: 1, 16>}, {transform_indices = @transform_9, window_bounds = array<i64: 2, 1, 8>}, {transform_indices = @transform_10, window_bounds = array<i64: 2, 8, 32>}]} {
    %c0 = arith.constant 0 : index
    %c0_0 = arith.constant 0 : index
    %c0_1 = arith.constant 0 : index
    %0 = vector.load %arg1[%c0, %c0_0, %c0_1] : memref<2x8x32xf32, #tpu.memory_space<vmem>>, vector<2x8x32xf32>
    %1 = vector.shape_cast %0 : vector<2x8x32xf32> to vector<16x32xf32>
    %c0_2 = arith.constant 0 : index
    %c0_3 = arith.constant 0 : index
    %c0_4 = arith.constant 0 : index
    %2 = vector.load %arg2[%c0_2, %c0_3, %c0_4] : memref<2x8x32xf32, #tpu.memory_space<vmem>>, vector<2x8x32xf32>
    %3 = vector.shape_cast %2 : vector<2x8x32xf32> to vector<16x32xf32>
    %c0_5 = arith.constant 0 : index
    %c0_6 = arith.constant 0 : index
    %c0_7 = arith.constant 0 : index
    %4 = vector.load %arg3[%c0_5, %c0_6, %c0_7] : memref<2x8x32xf32, #tpu.memory_space<vmem>>, vector<2x8x32xf32>
    %5 = vector.shape_cast %4 : vector<2x8x32xf32> to vector<16x32xf32>
    %c0_8 = arith.constant 0 : index
    %c0_9 = arith.constant 0 : index
    %6 = vector.load %arg4[%c0_8, %c0_9] : memref<32x32xf32, #tpu.memory_space<vmem>>, vector<32x32xf32>
    %cst = arith.constant dense<0.000000e+00> : vector<16x32xf32>
    %7 = tpu.matmul %1, %6, %cst {dimension_numbers = #tpu.dot_dimension_numbers<[1], [0], [0], [1], [0, 0, 1, 1], [], []>} : vector<16x32xf32>, vector<32x32xf32>, vector<16x32xf32> -> vector<16x32xf32>
    %c0_10 = arith.constant 0 : index
    %c0_11 = arith.constant 0 : index
    %8 = vector.load %arg5[%c0_10, %c0_11] : memref<1x32xf32, #tpu.memory_space<vmem>>, vector<1x32xf32>
    %9 = vector.broadcast %8 : vector<1x32xf32> to vector<16x32xf32>
    %10 = arith.addf %7, %9 : vector<16x32xf32>
    %cst_12 = arith.constant 2.500000e-01 : f32
    %11 = vector.broadcast %cst_12 : f32 to vector<16x32xf32>
    %12 = arith.mulf %10, %11 : vector<16x32xf32>
    %c0_13 = arith.constant 0 : index
    %c0_14 = arith.constant 0 : index
    %13 = vector.load %arg6[%c0_13, %c0_14] : memref<32x16xf32, #tpu.memory_space<vmem>>, vector<32x16xf32>
    %cst_15 = arith.constant dense<0.000000e+00> : vector<16x16xf32>
    %14 = tpu.matmul %3, %13, %cst_15 {dimension_numbers = #tpu.dot_dimension_numbers<[1], [0], [0], [1], [0, 0, 1, 1], [], []>} : vector<16x32xf32>, vector<32x16xf32>, vector<16x16xf32> -> vector<16x16xf32>
    %c0_16 = arith.constant 0 : index
    %c0_17 = arith.constant 0 : index
    %15 = vector.load %arg7[%c0_16, %c0_17] : memref<1x16xf32, #tpu.memory_space<vmem>>, vector<1x16xf32>
    %16 = vector.broadcast %15 : vector<1x16xf32> to vector<16x16xf32>
    %17 = arith.addf %14, %16 : vector<16x16xf32>
    %c0_18 = arith.constant 0 : index
    %c0_19 = arith.constant 0 : index
    %18 = vector.load %arg8[%c0_18, %c0_19] : memref<32x16xf32, #tpu.memory_space<vmem>>, vector<32x16xf32>
    %cst_20 = arith.constant dense<0.000000e+00> : vector<16x16xf32>
    %19 = tpu.matmul %5, %18, %cst_20 {dimension_numbers = #tpu.dot_dimension_numbers<[1], [0], [0], [1], [0, 0, 1, 1], [], []>} : vector<16x32xf32>, vector<32x16xf32>, vector<16x16xf32> -> vector<16x16xf32>
    %c0_21 = arith.constant 0 : index
    %c0_22 = arith.constant 0 : index
    %20 = vector.load %arg9[%c0_21, %c0_22] : memref<1x16xf32, #tpu.memory_space<vmem>>, vector<1x16xf32>
    %21 = vector.broadcast %20 : vector<1x16xf32> to vector<16x16xf32>
    %22 = arith.addf %19, %21 : vector<16x16xf32>
    %23 = vector.extract_strided_slice %17 {offsets = [0, 0], sizes = [8, 16], strides = [1, 1]} : vector<16x16xf32> to vector<8x16xf32>
    %24 = vector.extract_strided_slice %22 {offsets = [0, 0], sizes = [8, 16], strides = [1, 1]} : vector<16x16xf32> to vector<8x16xf32>
    %25 = vector.extract_strided_slice %12 {offsets = [0, 0], sizes = [8, 16], strides = [1, 1]} : vector<16x32xf32> to vector<8x16xf32>
    %cst_23 = arith.constant dense<0.000000e+00> : vector<8x8xf32>
    %26 = tpu.matmul %25, %23, %cst_23 {dimension_numbers = #tpu.dot_dimension_numbers<[1], [1], [0], [0], [0, 0, 1, 0], [], []>} : vector<8x16xf32>, vector<8x16xf32>, vector<8x8xf32> -> vector<8x8xf32>
    %cst_24 = arith.constant dense<0xFF800000> : vector<8xf32>
    %27 = vector.multi_reduction <maximumf>, %26, %cst_24 [1] : vector<8x8xf32> to vector<8xf32>
    %28 = vector.shape_cast %27 : vector<8xf32> to vector<8x1xf32>
    %29 = vector.broadcast %28 : vector<8x1xf32> to vector<8x8xf32>
    %30 = arith.subf %26, %29 : vector<8x8xf32>
    %31 = math.exp %30 : vector<8x8xf32>
    %cst_25 = arith.constant dense<0.000000e+00> : vector<8xf32>
    %32 = vector.multi_reduction <add>, %31, %cst_25 [1] : vector<8x8xf32> to vector<8xf32>
    %33 = vector.shape_cast %32 : vector<8xf32> to vector<8x1xf32>
    %cst_26 = arith.constant dense<0.000000e+00> : vector<8x16xf32>
    %34 = tpu.matmul %31, %24, %cst_26 {dimension_numbers = #tpu.dot_dimension_numbers<[1], [0], [0], [1], [0, 0, 1, 1], [], []>} : vector<8x8xf32>, vector<8x16xf32>, vector<8x16xf32> -> vector<8x16xf32>
    %35 = tpu.reciprocal %33 {approx = true} : vector<8x1xf32> -> vector<8x1xf32>
    %36 = vector.broadcast %35 : vector<8x1xf32> to vector<8x16xf32>
    %37 = arith.mulf %34, %36 : vector<8x16xf32>
    %38 = vector.extract_strided_slice %12 {offsets = [0, 16], sizes = [8, 16], strides = [1, 1]} : vector<16x32xf32> to vector<8x16xf32>
    %cst_27 = arith.constant dense<0.000000e+00> : vector<8x8xf32>
    %39 = tpu.matmul %38, %23, %cst_27 {dimension_numbers = #tpu.dot_dimension_numbers<[1], [1], [0], [0], [0, 0, 1, 0], [], []>} : vector<8x16xf32>, vector<8x16xf32>, vector<8x8xf32> -> vector<8x8xf32>
    %cst_28 = arith.constant dense<0xFF800000> : vector<8xf32>
    %40 = vector.multi_reduction <maximumf>, %39, %cst_28 [1] : vector<8x8xf32> to vector<8xf32>
    %41 = vector.shape_cast %40 : vector<8xf32> to vector<8x1xf32>
    %42 = vector.broadcast %41 : vector<8x1xf32> to vector<8x8xf32>
    %43 = arith.subf %39, %42 : vector<8x8xf32>
    %44 = math.exp %43 : vector<8x8xf32>
    %cst_29 = arith.constant dense<0.000000e+00> : vector<8xf32>
    %45 = vector.multi_reduction <add>, %44, %cst_29 [1] : vector<8x8xf32> to vector<8xf32>
    %46 = vector.shape_cast %45 : vector<8xf32> to vector<8x1xf32>
    %cst_30 = arith.constant dense<0.000000e+00> : vector<8x16xf32>
    %47 = tpu.matmul %44, %24, %cst_30 {dimension_numbers = #tpu.dot_dimension_numbers<[1], [0], [0], [1], [0, 0, 1, 1], [], []>} : vector<8x8xf32>, vector<8x16xf32>, vector<8x16xf32> -> vector<8x16xf32>
    %48 = tpu.reciprocal %46 {approx = true} : vector<8x1xf32> -> vector<8x1xf32>
    %49 = vector.broadcast %48 : vector<8x1xf32> to vector<8x16xf32>
    %50 = arith.mulf %47, %49 : vector<8x16xf32>
    %51 = tpu.concatenate %37, %50 in 1 : vector<8x16xf32>, vector<8x16xf32> -> vector<8x32xf32>
    %52 = vector.extract_strided_slice %17 {offsets = [8, 0], sizes = [8, 16], strides = [1, 1]} : vector<16x16xf32> to vector<8x16xf32>
    %53 = vector.extract_strided_slice %22 {offsets = [8, 0], sizes = [8, 16], strides = [1, 1]} : vector<16x16xf32> to vector<8x16xf32>
    %54 = vector.extract_strided_slice %12 {offsets = [8, 0], sizes = [8, 16], strides = [1, 1]} : vector<16x32xf32> to vector<8x16xf32>
    %cst_31 = arith.constant dense<0.000000e+00> : vector<8x8xf32>
    %55 = tpu.matmul %54, %52, %cst_31 {dimension_numbers = #tpu.dot_dimension_numbers<[1], [1], [0], [0], [0, 0, 1, 0], [], []>} : vector<8x16xf32>, vector<8x16xf32>, vector<8x8xf32> -> vector<8x8xf32>
    %cst_32 = arith.constant dense<0xFF800000> : vector<8xf32>
    %56 = vector.multi_reduction <maximumf>, %55, %cst_32 [1] : vector<8x8xf32> to vector<8xf32>
    %57 = vector.shape_cast %56 : vector<8xf32> to vector<8x1xf32>
    %58 = vector.broadcast %57 : vector<8x1xf32> to vector<8x8xf32>
    %59 = arith.subf %55, %58 : vector<8x8xf32>
    %60 = math.exp %59 : vector<8x8xf32>
    %cst_33 = arith.constant dense<0.000000e+00> : vector<8xf32>
    %61 = vector.multi_reduction <add>, %60, %cst_33 [1] : vector<8x8xf32> to vector<8xf32>
    %62 = vector.shape_cast %61 : vector<8xf32> to vector<8x1xf32>
    %cst_34 = arith.constant dense<0.000000e+00> : vector<8x16xf32>
    %63 = tpu.matmul %60, %53, %cst_34 {dimension_numbers = #tpu.dot_dimension_numbers<[1], [0], [0], [1], [0, 0, 1, 1], [], []>} : vector<8x8xf32>, vector<8x16xf32>, vector<8x16xf32> -> vector<8x16xf32>
    %64 = tpu.reciprocal %62 {approx = true} : vector<8x1xf32> -> vector<8x1xf32>
    %65 = vector.broadcast %64 : vector<8x1xf32> to vector<8x16xf32>
    %66 = arith.mulf %63, %65 : vector<8x16xf32>
    %67 = vector.extract_strided_slice %12 {offsets = [8, 16], sizes = [8, 16], strides = [1, 1]} : vector<16x32xf32> to vector<8x16xf32>
    %cst_35 = arith.constant dense<0.000000e+00> : vector<8x8xf32>
    %68 = tpu.matmul %67, %52, %cst_35 {dimension_numbers = #tpu.dot_dimension_numbers<[1], [1], [0], [0], [0, 0, 1, 0], [], []>} : vector<8x16xf32>, vector<8x16xf32>, vector<8x8xf32> -> vector<8x8xf32>
    %cst_36 = arith.constant dense<0xFF800000> : vector<8xf32>
    %69 = vector.multi_reduction <maximumf>, %68, %cst_36 [1] : vector<8x8xf32> to vector<8xf32>
    %70 = vector.shape_cast %69 : vector<8xf32> to vector<8x1xf32>
    %71 = vector.broadcast %70 : vector<8x1xf32> to vector<8x8xf32>
    %72 = arith.subf %68, %71 : vector<8x8xf32>
    %73 = math.exp %72 : vector<8x8xf32>
    %cst_37 = arith.constant dense<0.000000e+00> : vector<8xf32>
    %74 = vector.multi_reduction <add>, %73, %cst_37 [1] : vector<8x8xf32> to vector<8xf32>
    %75 = vector.shape_cast %74 : vector<8xf32> to vector<8x1xf32>
    %cst_38 = arith.constant dense<0.000000e+00> : vector<8x16xf32>
    %76 = tpu.matmul %73, %53, %cst_38 {dimension_numbers = #tpu.dot_dimension_numbers<[1], [0], [0], [1], [0, 0, 1, 1], [], []>} : vector<8x8xf32>, vector<8x16xf32>, vector<8x16xf32> -> vector<8x16xf32>
    %77 = tpu.reciprocal %75 {approx = true} : vector<8x1xf32> -> vector<8x1xf32>
    %78 = vector.broadcast %77 : vector<8x1xf32> to vector<8x16xf32>
    %79 = arith.mulf %76, %78 : vector<8x16xf32>
    %80 = tpu.concatenate %66, %79 in 1 : vector<8x16xf32>, vector<8x16xf32> -> vector<8x32xf32>
    %81 = vector.shape_cast %51 : vector<8x32xf32> to vector<1x8x32xf32>
    %82 = vector.shape_cast %80 : vector<8x32xf32> to vector<1x8x32xf32>
    %83 = tpu.concatenate %81, %82 in 0 : vector<1x8x32xf32>, vector<1x8x32xf32> -> vector<2x8x32xf32>
    %c0_39 = arith.constant 0 : index
    %c0_40 = arith.constant 0 : index
    %c0_41 = arith.constant 0 : index
    %84 = vector.load %arg11[%c0_39, %c0_40, %c0_41] : memref<2x8x32xf32, #tpu.memory_space<vmem>>, vector<2x8x32xf32>
    tpu.vector_store %arg11[%c0_39, %c0_40, %c0_41], %83 {strides = array<i32>} : memref<2x8x32xf32, #tpu.memory_space<vmem>>, vector<2x8x32xf32>,
    return
  }
  func.func @transform_0(%arg0: i32) -> (i32, i32, i32) {
    %c0_i32 = arith.constant 0 : i32
    %c0_i32_0 = arith.constant 0 : i32
    %c0_i32_1 = arith.constant 0 : i32
    return %arg0, %c0_i32, %c0_i32_0 : i32, i32, i32
  }
  func.func @transform_1(%arg0: i32) -> (i32, i32, i32) {
    %c0_i32 = arith.constant 0 : i32
    %c0_i32_0 = arith.constant 0 : i32
    %c0_i32_1 = arith.constant 0 : i32
    return %arg0, %c0_i32, %c0_i32_0 : i32, i32, i32
  }
  func.func @transform_2(%arg0: i32) -> (i32, i32, i32) {
    %c0_i32 = arith.constant 0 : i32
    %c0_i32_0 = arith.constant 0 : i32
    %c0_i32_1 = arith.constant 0 : i32
    return %arg0, %c0_i32, %c0_i32_0 : i32, i32, i32
  }
  func.func @transform_3(%arg0: i32) -> (i32, i32) {
    %c0_i32 = arith.constant 0 : i32
    %c0_i32_0 = arith.constant 0 : i32
    %c0_i32_1 = arith.constant 0 : i32
    return %c0_i32, %c0_i32_0 : i32, i32
  }
  func.func @transform_4(%arg0: i32) -> (i32, i32) {
    %c0_i32 = arith.constant 0 : i32
    %c0_i32_0 = arith.constant 0 : i32
    %c0_i32_1 = arith.constant 0 : i32
    return %c0_i32, %c0_i32_0 : i32, i32
  }
  func.func @transform_5(%arg0: i32) -> (i32, i32) {
    %c0_i32 = arith.constant 0 : i32
    %c0_i32_0 = arith.constant 0 : i32
    %c0_i32_1 = arith.constant 0 : i32
    return %c0_i32, %c0_i32_0 : i32, i32
  }
  func.func @transform_6(%arg0: i32) -> (i32, i32) {
    %c0_i32 = arith.constant 0 : i32
    %c0_i32_0 = arith.constant 0 : i32
    %c0_i32_1 = arith.constant 0 : i32
    return %c0_i32, %c0_i32_0 : i32, i32
  }
  func.func @transform_7(%arg0: i32) -> (i32, i32) {
    %c0_i32 = arith.constant 0 : i32
    %c0_i32_0 = arith.constant 0 : i32
    %c0_i32_1 = arith.constant 0 : i32
    return %c0_i32, %c0_i32_0 : i32, i32
  }
  func.func @transform_8(%arg0: i32) -> (i32, i32) {
    %c0_i32 = arith.constant 0 : i32
    %c0_i32_0 = arith.constant 0 : i32
    %c0_i32_1 = arith.constant 0 : i32
    return %c0_i32, %c0_i32_0 : i32, i32
  }
  func.func @transform_9(%arg0: i32) -> (i32, i32, i32) {
    %c0_i32 = arith.constant 0 : i32
    %c0_i32_0 = arith.constant 0 : i32
    %c0_i32_1 = arith.constant 0 : i32
    return %arg0, %c0_i32, %c0_i32_0 : i32, i32, i32
  }
  func.func @transform_10(%arg0: i32) -> (i32, i32, i32) {
    %c0_i32 = arith.constant 0 : i32
    %c0_i32_0 = arith.constant 0 : i32
    %c0_i32_1 = arith.constant 0 : i32
    return %arg0, %c0_i32, %c0_i32_0 : i32, i32, i32
  }
}

</mosaic_0001>

<bundles_post_ra>
// kernel: tpu_custom_call.1
= control target key start
LH: loop header
LB: loop body
LE: loop exit
PB: predicated region body
PF: predicated region fallthrough
CT: control target
= control target key end

     0   :  { %s1342_s0 = inlined_call_operand.vmem [shape: f32[2,8,32], index: 0, kind: input, shape index: {}]   ;;  %s1343_s1 = inlined_call_operand.vmem [shape: f32[2,8,32], index: 1, kind: input, shape index: {}]   ;;  %s1344_s2 = inlined_call_operand.vmem [shape: f32[2,8,32], index: 2, kind: input, shape index: {}]   ;;  %s1345_s3 = inlined_call_operand.vmem [shape: f32[32,32], index: 3, kind: input, shape index: {}]   ;;  %s1346_s4 = inlined_call_operand.vmem [shape: f32[1,32], index: 4, kind: input, shape index: {}]   ;;  %s1347_s5 = inlined_call_operand.vmem [shape: f32[32,16], index: 5, kind: input, shape index: {}]   ;;  %s1348_s6 = inlined_call_operand.vmem [shape: f32[1,16], index: 6, kind: input, shape index: {}]   ;;  %s1349_s7 = inlined_call_operand.vmem [shape: f32[32,16], index: 7, kind: input, shape index: {}]   ;;  %s1350_s8 = inlined_call_operand.vmem [shape: f32[1,16], index: 8, kind: input, shape index: {}]   ;;  %s1351_s9 = inlined_call_operand.vmem [shape: s32[2,1,8], index: 9, kind: input, shape index: {}]   ;;  %s1352_s10 = inlined_call_operand.hbm [shape: f32[2,8,32], index: 10, kind: output, shape index: {}]  }
   0x1   :  { %v45_v0 = vld [vmem:[%s1345_s3 + $0x18] sm:$0xff]  ;;  %v44_v2 = vld [vmem:[%s1345_s3 + $0x10] sm:$0xff]  ;;  %v43_v4 = vld [vmem:[%s1345_s3 + $0x8] sm:$0xff] }
   0x2   :  { %v140_v1 = vld [vmem:[%s1347_s5 + $0x18] sm:$0xff]  ;;  %1042 = vmatprep.subr.mxu0 %v45_v0  ;;  %v139_v3 = vld [vmem:[%s1347_s5 + $0x10] sm:$0xff]  ;;  %v138_v5 = vld [vmem:[%s1347_s5 + $0x8] sm:$0xff] }
   0x3   :  { %1053 = vmatprep.subr.mxu1 %v140_v1  ;;  %1043 = vmatpush3.msra.mxu0 %v45_v0  ;;  %v42_v6 = vld [vmem:[%s1345_s3] sm:$0xff] }
   0x4   :  { %1054 = vmatpush3.msra.mxu1 %v140_v1  ;;  %1044 = vmatprep.subr.mxu0 %v44_v2  ;;  %v137_v7 = vld [vmem:[%s1347_s5] sm:$0xff] }
   0x5   :  { %1055 = vmatprep.subr.mxu1 %v139_v3  ;;  %1045 = vmatpush3.msra.mxu0 %v44_v2 }
   0x6   :  { %1056 = vmatpush3.msra.mxu1 %v139_v3 }
   0x7   :  { %15 = vsyncpa [#allocation3], 0  ;;  %1046 = vmatprep.subr.mxu0 %v43_v4  ;;  %1057 = vmatprep.subr.mxu1 %v138_v5  ;;  %v36_v8 = vld [vmem:[%s1342_s0] sm:$0xff]  ;;  %vm53_vm0 = vcmask 261120   ;;  %v37_v10 = vld [vmem:[%s1342_s0 + $0x8] sm:$0xff]  ;;  %v1160_v12 = vmov 0.0  }
   0x8   :  { %1047 = vmatpush3.msra.mxu0 %v43_v4  ;;  %1058 = vmatpush3.msra.mxu1 %v138_v5  ;;  %v38_v9 = vld [vmem:[%s1343_s1] sm:$0xff]  ;;  %v39_v11 = vld [vmem:[%s1343_s1 + $0x8] sm:$0xff]  ;;  %vm1161_vm1 = vmmov 0   ;;  %v232_v13 = vld [vmem:[%s1349_s7 + $0x18] sm:$0xff]  ;;  %vm321_vm2 = vcmask 130048   ;;  %vm398_vm3 = vcmask 64512  }
   0x9   :  { %1048 = vmatprep.subr.mxu0 %v42_v6  ;;  %1059 = vmatprep.subr.mxu1 %v137_v7  ;;  %v231_v14 = vld [vmem:[%s1349_s7 + $0x10] sm:$0xff]  ;;  %v40_v15 = vld [vmem:[%s1344_s2] sm:$0xff]  ;;  %v230_v16 = vld [vmem:[%s1349_s7 + $0x8] sm:$0xff]  ;;  %s1164_s26 = smov [#allocation2]  }
   0xa   :  { %1049 = vmatpush3.msra.mxu0 %v42_v6  ;;  %1050 = vmatprep.mubr.msk.f32.mxu0 %vm53_vm0, %v36_v8  ;;  %v229_v17 = vld [vmem:[%s1349_s7] sm:$0xff]  ;;  %v41_v18 = vld [vmem:[%s1344_s2 + $0x8] sm:$0xff]  ;;  %s1162_s2 = smov 112   ;;  %s976_s27 = sshll.u32 %s1164_s26, 4  ;;  %s977_s27 = int_to_ptr.vmem [resolvable:$true] %s976_s27 }
   0xb   :  { %1060 = vmatpush3.msra.mxu1 %v137_v7  ;;  %1061 = vmatprep.mubr.msk.f32.mxu1 %vm53_vm0, %v38_v9  ;;  %v990_v21 = vld [vmem:[%s1348_s6] ss:$0 sm:$0xff]  ;;  %s1138_s28 = scalar_lea.vmem %s977_s27, 256  ;;  %p1143_p1 = scmp.lt.s32.totalorder %s977_s27, %s977_s27 }
   0xc   :  { %1051 = vmatmul.mubr.msk.f32.vlgmr.msra.gmra.mxu0 %vm53_vm0, %v37_v10  ;;  %1062 = vmatmul.mubr.msk.f32.vlgmr.msra.gmra.mxu1 %vm53_vm0, %v39_v11  ;;  %v987_v23 = vld [vmem:[%s1346_s4] ss:$0 sm:$0xff]  ;;  %p1139_p0 = scmp.ne.s32.totalorder %s977_s27, %s1138_s28  ;;  %p1144_p2 = scmp.lt.s32.totalorder %s1138_s28, %s1138_s28 }
   0xd   :  { %1075 = vmatprep.subr.mxu1 %v1160_v12  ;;  %1077 = vmatprep.mubr.msk.f32.mxu1 %vm1161_vm1, %v1160_v12  ;;  %v993_v31 = vld [vmem:[%s1350_s8] ss:$0 sm:$0xff]  ;;  %s1163_s8 = smov 16  }
   0xe   :  { %1064 = vmatprep.subr.mxu0 %v232_v13  ;;  %1072 = vmatprep.mubr.msk.f32.mxu0 %vm53_vm0, %v40_v15  ;;  %p1145_p3 = por %p1144_p2, %p1143_p1 }
   0xf   :  { %1065 = vmatpush3.msra.mxu0 %v232_v13 }
  0x10   :  { %1066 = vmatprep.subr.mxu0 %v231_v14  ;;  %p1146_p4 = pnand %p1145_p3, %p1139_p0 }
  0x11   :  { %1067 = vmatpush3.msra.mxu0 %v231_v14 }
  0x12   :  { %1068 = vmatprep.subr.mxu0 %v230_v16 }
  0x13   :  { %1069 = vmatpush3.msra.mxu0 %v230_v16 }
  0x14   :  { %1070 = vmatprep.subr.mxu0 %v229_v17 }
  0x15   :  { %1071 = vmatpush3.msra.mxu0 %v229_v17 }
  0x16   :  { %1085 = vmatprep.subr.mxu0 %v1160_v12  ;;  %1073 = vmatmul.mubr.msk.f32.vlgmr.msra.gmra.mxu0 %vm53_vm0, %v41_v18 }
  0x17   :  { %1087 = vmatprep.mubr.msk.f32.mxu0 %vm1161_vm1, %v1160_v12 }
  0xcc   :  { %v1052_v19 = vpop.f32.mrf.mxu0  ;;  %v1063_v20 = vpop.f32.mrf.mxu1 }
  0xcd   :  { %v226_v22 = vadd.f32 %v1063_v20, %v990_v21  ;;  %v132_v28 = vadd.f32 %v1052_v19, %v987_v23 }
  0xce   :  { %v126_v24 = vpop.f32.mrf.mxu0  ;;  %v220_v25 = vpop.f32.mrf.mxu1 }
  0xcf   :  { %v127_v26 = vadd.f32 %v987_v23, %v126_v24  ;;  %v221_v27 = vadd.f32 %v990_v21, %v220_v25  ;;  %v136_v30 = vmul.f32 0.25, %v132_v28 }
  0xd1   :  { %v135_v29 = vmul.f32 0.25, %v127_v26  ;;  %1076 = vmatpush3.xpose.msk.msra.mxu1 %vm321_vm2, %v221_v27  ;;  %1086 = vmatpush3.xpose.msk.msra.mxu0 %vm321_vm2, %v221_v27 }
  0xd2   :  { %1095 = vmatprep.subr.mxu0 %v1160_v12  ;;  %1080 = vmatprep.subr.mxu1 %v1160_v12 }
  0xd3   :  { %483 = vrot.lane.b32.xlu0 %v135_v29, %s1162_s2 }
  0xd4   :  { %1078 = vmatmul.mubr.msk.f32.vlgmr.msra.gmra.mxu1 %vm321_vm2, %v135_v29 }
  0xd5   :  { %1082 = vmatprep.mubr.msk.f32.mxu1 %vm1161_vm1, %v1160_v12 }
  0xd6   :  { %v1074_v32 = vpop.f32.mrf.mxu0 }
  0xd7   :  { %806 = vrot.lane.b32.xlu0 %v136_v30, %s1162_s2  ;;  %v318_v33 = vadd.f32 %v1074_v32, %v993_v31 }
  0xd8   :  { %v312_v34 = vpop.f32.mrf.mxu0 }
  0xd9   :  { %v313_v35 = vadd.f32 %v993_v31, %v312_v34 }
  0xdb   :  { %1081 = vmatpush3.msra.mxu1 %v313_v35 }
  0xdc   :  { %1090 = vmatprep.subr.mxu1 %v1160_v12 }
 0x145   :  { %v484_v36 = vpop.permute.xlu0 %483 }
 0x146   :  { %1088 = vmatmul.mubr.msk.f32.vlgmr.msra.gmra.mxu0 %vm321_vm2, %v484_v36 }
 0x147   :  { %1096 = vmatpush3.xpose.msk.msra.mxu0 %vm321_vm2, %v226_v22  ;;  %1097 = vmatprep.mubr.msk.f32.mxu0 %vm1161_vm1, %v1160_v12 }
 0x148   :  { %1105 = vmatprep.subr.mxu0 %v1160_v12 }
 0x149   :  { %v807_v37 = vpop.permute.xlu0 %806 }
 0x14a   :  { %1098 = vmatmul.mubr.msk.f32.vlgmr.msra.gmra.mxu0 %vm321_vm2, %v136_v30 }
 0x14b   :  { %1106 = vmatpush3.xpose.msk.msra.mxu0 %vm321_vm2, %v226_v22  ;;  %1107 = vmatprep.mubr.msk.f32.mxu0 %vm1161_vm1, %v1160_v12 }
 0x14e   :  { %1108 = vmatmul.mubr.msk.f32.vlgmr.msra.gmra.mxu0 %vm321_vm2, %v807_v37 }
 0x194   :  { %v394_v38 = vpop.f32.mrf.mxu1 }
 0x195   :  { %v399_v39 = vsel %vm398_vm3, %v394_v38, -inf }
 0x196   :  { %400 = vmax.xlane.f32.xlu1 %v399_v39  ;;  %v1079_v40 = vpop.f32.mrf.mxu1 }
 0x206   :  { %v553_v41 = vpop.f32.mrf.mxu0 }
 0x207   :  { %v557_v42 = vsel %vm398_vm3, %v553_v41, -inf }
 0x208   :  { %v1089_v43 = vpop.f32.mrf.mxu0  ;;  %558 = vmax.xlane.f32.xlu1 %v557_v42 }
 0x20a   :  { %v718_v44 = vpop.f32.mrf.mxu0 }
 0x20b   :  { %v722_v45 = vsel %vm398_vm3, %v718_v44, -inf }
 0x20c   :  { %723 = vmax.xlane.f32.xlu0 %v722_v45  ;;  %v1099_v46 = vpop.f32.mrf.mxu0 }
 0x20e   :  { %v876_v47 = vpop.f32.mrf.mxu0 }
 0x20f   :  { %v880_v48 = vsel %vm398_vm3, %v876_v47, -inf }
 0x210   :  { %v1109_v49 = vpop.f32.mrf.mxu0  ;;  %881 = vmax.xlane.f32.xlu1 %v880_v48 }
 0x21f   :  { %v401_v50 = vpop.xlane.xlu1 %400 }
 0x220   :  { %v402_v51 = vsub.f32 %v394_v38, %v401_v50 }
 0x222   :  { %v403_v52 = vmul.f32 1.442695, %v402_v51 }
 0x224   :  { %1122 = vpow2.f32 %v403_v52 }
 0x231   :  { %v1123_v53 = vpop.eup %1122 }
 0x232   :  { %1083 = vmatmul.mubr.msk.f32.vlgmr.msra.gmra.mxu1 %vm398_vm3, %v1123_v53  ;;  %v405_v4 = vsel %vm398_vm3, %v1123_v53, 0.0 }
 0x233   :  { %1091 = vmatpush3.msra.mxu1 %v313_v35  ;;  %1092 = vmatprep.mubr.msk.f32.mxu1 %vm1161_vm1, %v1160_v12 }
 0x234   :  { %1100 = vmatprep.subr.mxu1 %v1160_v12 }
 0x291   :  { %v559_v54 = vpop.xlane.xlu1 %558 }
 0x292   :  { %v560_v55 = vsub.f32 %v553_v41, %v559_v54 }
 0x294   :  { %v561_v56 = vmul.f32 1.442695, %v560_v55 }
 0x295   :  { %v724_v57 = vpop.xlane.xlu0 %723 }
 0x296   :  { %1124 = vpow2.f32 %v561_v56  ;;  %v725_v58 = vsub.f32 %v718_v44, %v724_v57 }
 0x298   :  { %v726_v59 = vmul.f32 1.442695, %v725_v58 }
 0x299   :  { %v882_v60 = vpop.xlane.xlu1 %881 }
 0x29a   :  { %1126 = vpow2.f32 %v726_v59  ;;  %v883_v61 = vsub.f32 %v876_v47, %v882_v60 }
 0x29c   :  { %v884_v62 = vmul.f32 1.442695, %v883_v61 }
 0x29e   :  { %1128 = vpow2.f32 %v884_v62 }
 0x2a3   :  { %v1125_v63 = vpop.eup %1124 }
 0x2a4   :  { %1093 = vmatmul.mubr.msk.f32.vlgmr.msra.gmra.mxu1 %vm398_vm3, %v1125_v63  ;;  %v563_v0 = vsel %vm398_vm3, %v1125_v63, 0.0 }
 0x2a5   :  { %1101 = vmatpush3.msra.mxu1 %v318_v33  ;;  %564 = vadd.xlane.f32.xlu1 %v563_v0 }
 0x2a6   :  { %1102 = vmatprep.mubr.msk.f32.mxu1 %vm1161_vm1, %v1160_v12  ;;  %1110 = vmatprep.subr.mxu1 %v1160_v12 }
 0x2a7   :  { %v1127_v1 = vpop.eup %1126 }
 0x2a8   :  { %1103 = vmatmul.mubr.msk.f32.vlgmr.msra.gmra.mxu1 %vm398_vm3, %v1127_v1  ;;  %v728_v5 = vsel %vm398_vm3, %v1127_v1, 0.0 }
 0x2a9   :  { %1111 = vmatpush3.msra.mxu1 %v318_v33  ;;  %1112 = vmatprep.mubr.msk.f32.mxu1 %vm1161_vm1, %v1160_v12 }
 0x2ab   :  { %v1129_v2 = vpop.eup %1128 }
 0x2ac   :  { %1113 = vmatmul.mubr.msk.f32.vlgmr.msra.gmra.mxu1 %vm398_vm3, %v1129_v2  ;;  %v886_v3 = vsel %vm398_vm3, %v1129_v2, 0.0 }
 0x2ad   :  { %887 = vadd.xlane.f32.xlu1 %v886_v3 }
 0x2b1   :  { %406 = vadd.xlane.f32.xlu1 %v405_v4 }
 0x2b5   :  { %729 = vadd.xlane.f32.xlu1 %v728_v5 }
 0x2f2   :  { %v477_v6 = vpop.f32.mrf.mxu1 }
 0x2f4   :  { %v1084_v7 = vpop.f32.mrf.mxu1 }
 0x32e   :  { %v565_v8 = vpop.xlane.xlu1 %564 }
 0x32f   :  { %1130 = vrcp.f32 %v565_v8 }
 0x336   :  { %v888_v9 = vpop.xlane.xlu1 %887 }
 0x337   :  { %1132 = vrcp.f32 %v888_v9 }
 0x33a   :  { %v407_v20 = vpop.xlane.xlu1 %406 }
 0x33b   :  { %1134 = vrcp.f32 %v407_v20 }
 0x33c   :  { %v1131_v10 = vpop.eup %1130 }
 0x33e   :  { %v730_v21 = vpop.xlane.xlu1 %729 }
 0x33f   :  { %1136 = vrcp.f32 %v730_v21 }
 0x344   :  { %v1133_v16 = vpop.eup %1132 }
 0x348   :  { %v1135_v22 = vpop.eup %1134 }
 0x349   :  { %v482_v23 = vmul.f32 %v1135_v22, %v477_v6 }
 0x34c   :  { %v1137_v26 = vpop.eup %1136 }
 0x364   :  { %v635_v11 = vpop.f32.mrf.mxu1 }
 0x365   :  { %v640_v12 = vmul.f32 %v1131_v10, %v635_v11 }
 0x366   :  { %v1094_v13 = vpop.f32.mrf.mxu1 }
 0x367   :  { %642 = vrot.lane.b32.xlu1 %v640_v12, %s1163_s8 }
 0x368   :  { %v800_v14 = vpop.f32.mrf.mxu1 }
 0x369   :  { %v805_v27 = vmul.f32 %v1137_v26, %v800_v14 }
 0x36a   :  { %v1104_v15 = vpop.f32.mrf.mxu1 }
 0x36c   :  { %v958_v17 = vpop.f32.mrf.mxu1 }
 0x36d   :  { %v963_v18 = vmul.f32 %v1133_v16, %v958_v17 }
 0x36e   :  { %v1114_v19 = vpop.f32.mrf.mxu1 }
 0x36f   :  { %965 = vrot.lane.b32.xlu0 %v963_v18, %s1163_s8 }
 0x3d9   :  { %v643_v24 = vpop.permute.xlu1 %642 }
 0x3da   :  { %v645_v25 = vsel %vm321_vm2, %v482_v23, %v643_v24 }
 0x3db   :  { %969 = vst.msk [vmem:[#allocation2] sm:$0xff] %vm53_vm0, %v645_v25 }
 0x3e1   :  { %v966_v28 = vpop.permute.xlu0 %965 }
 0x3e2   :  { %v968_v29 = vsel %vm321_vm2, %v805_v27, %v966_v28 }
 0x3e3   :  { %970 = vst.msk [vmem:[#allocation2 + $0x8] sm:$0xff] %vm53_vm0, %v968_v29 }
 0x3e4   :  { %1149 = shalt.err (!%p1146_p4)
}
 0x3e5   :  { %s1165_s29 = smov 128   ;;  %s1166_s30 = smov 8  }
 0x3e6   :  { %982 = dma.vmem_to_hbm [thread:$0]  %s977_s27, 256, %s1352_s10, [#allocation3], %s1165_s29, %s1165_s29, %s1166_s30  }
 0x3e7   :  { %1158 = dma.done.wait [#allocation3], 256  }
 0x3e8   :  { %1159 = vsyncadd [#allocation3], 4294967040 }
 0x3e9   :  { %986 = vsyncpa [#allocation3], 1 }

</bundles_post_ra>
